<compile_context>
chip_gen: v6e
topology: v6e:2x2x1
jax: 0.10.0
libtpu: 0.0.40
codegen_flags: <defaults>
</compile_context>

<pallas_src>
import functools

import jax
import jax.numpy as jnp
from jax.experimental import pallas as pl
from jax.experimental.pallas import tpu as pltpu


_ROW_TILE = 512  # row / contraction tile for the aggregation matmul


def _round_up(x, m):
    return (x + m - 1) // m * m


def _padded_num_nodes(n):
    n_pad = _round_up(n, 128)
    if n_pad > _ROW_TILE:
        n_pad = _round_up(n_pad, _ROW_TILE)
    return n_pad


def _vmem_limit(working_set_bytes):
    # Explicit scoped-VMEM limit: 2x working set + headroom, clamped to a range
    # that is safe on every generation (v7x physical VMEM is 64 MiB).
    return int(min(max(2 * working_set_bytes + (8 << 20), 32 << 20), 48 << 20))


# ---------------------------------------------------------------------------
# Kernel 1: per-layer feature transform for all views sharing this adjacency.
#   h_ref : (tm, n_views * f_pad)  bf16   [H1 | H2 | ...]
#   w_ref : (f_pad, h_pad)         bf16   shared GCN weight
#   o_ref : (tm, n_views * h_pad)  bf16   [H1@W | H2@W | ...]
# ---------------------------------------------------------------------------
def _feature_transform_kernel(h_ref, w_ref, o_ref, *, n_views, f_pad, h_pad):
    w = w_ref[...]
    for v in range(n_views):
        hv = h_ref[:, v * f_pad:(v + 1) * f_pad]
        xw = jnp.dot(hv, w, preferred_element_type=jnp.float32)
        o_ref[:, v * h_pad:(v + 1) * h_pad] = xw.astype(o_ref.dtype)


def _feature_transform(h_cat, w_pad, *, n_views, f_pad, h_pad, tm):
    n_pad = h_cat.shape[0]
    vmem_est = (2 * tm * n_views * f_pad * 2      # H tiles (double-buffered)
                + f_pad * h_pad * 2               # resident weight
                + 2 * tm * n_views * h_pad * 2)   # output tiles
    kernel = functools.partial(_feature_transform_kernel, n_views=n_views,
                               f_pad=f_pad, h_pad=h_pad)
    return pl.pallas_call(
        kernel,
        out_shape=jax.ShapeDtypeStruct((n_pad, n_views * h_pad), jnp.bfloat16),
        grid=(n_pad // tm,),
        in_specs=[
            pl.BlockSpec((tm, n_views * f_pad), lambda i: (i, 0)),
            # Grid-invariant weight: keep resident, single-buffered.
            pl.BlockSpec((f_pad, h_pad), lambda i: (0, 0),
                         pipeline_mode=pl.Buffered(1)),
        ],
        out_specs=pl.BlockSpec((tm, n_views * h_pad), lambda i: (i, 0)),
        compiler_params=pltpu.CompilerParams(
            dimension_semantics=("parallel",),
            vmem_limit_bytes=_vmem_limit(vmem_est)),
    )(h_cat, w_pad)


# ---------------------------------------------------------------------------
# Kernel 2: row-tiled neighborhood aggregation  out = A @ XW_cat + b  (+ReLU).
#   a_ref  : (tm, tk)              bf16   normalized-adjacency panel
#   xw_ref : (tk, n_views * h_pad) bf16   transformed features (k-rows)
#   b_ref  : (1, n_views * h_pad)  f32    bias, tiled per view
#   o_ref  : (tm, n_views * h_pad) bf16/f32
#   acc_ref: (tm, n_views * h_pad) f32    VMEM accumulator
# ---------------------------------------------------------------------------
def _aggregate_kernel(a_ref, xw_ref, b_ref, o_ref, acc_ref, *, apply_relu):
    k = pl.program_id(1)

    @pl.when(k == 0)
    def _():
        acc_ref[...] = jnp.zeros_like(acc_ref)

    acc_ref[...] += jnp.dot(a_ref[...], xw_ref[...],
                            preferred_element_type=jnp.float32)

    @pl.when(k == pl.num_programs(1) - 1)
    def _():
        out = acc_ref[...] + b_ref[...]
        if apply_relu:
            out = jnp.maximum(out, 0.0)
        o_ref[...] = out.astype(o_ref.dtype)


def _aggregate(a_pad, xw_cat, b_cat, *, apply_relu, out_dtype, tm, tk):
    n_pad = a_pad.shape[0]
    hc = xw_cat.shape[1]
    out_bytes = jnp.dtype(out_dtype).itemsize
    vmem_est = (2 * tm * tk * 2        # A panels (double-buffered)
                + 2 * tk * hc * 2      # XW panels
                + hc * 4               # bias
                + tm * hc * 4          # f32 accumulator
                + 2 * tm * hc * out_bytes)
    cost = pl.CostEstimate(
        flops=2 * n_pad * n_pad * hc,
        transcendentals=0,
        bytes_accessed=(n_pad * n_pad * 2
                        + (n_pad // tm) * n_pad * hc * 2
                        + n_pad * hc * out_bytes),
    )
    kernel = functools.partial(_aggregate_kernel, apply_relu=apply_relu)
    return pl.pallas_call(
        kernel,
        out_shape=jax.ShapeDtypeStruct((n_pad, hc), out_dtype),
        grid=(n_pad // tm, n_pad // tk),
        in_specs=[
            pl.BlockSpec((tm, tk), lambda i, k: (i, k)),
            pl.BlockSpec((tk, hc), lambda i, k: (k, 0)),
            # Grid-invariant bias: single-buffered.
            pl.BlockSpec((1, hc), lambda i, k: (0, 0),
                         pipeline_mode=pl.Buffered(1)),
        ],
        out_specs=pl.BlockSpec((tm, hc), lambda i, k: (i, 0)),
        scratch_shapes=[pltpu.VMEM((tm, hc), jnp.float32)],
        compiler_params=pltpu.CompilerParams(
            dimension_semantics=("parallel", "arbitrary"),
            vmem_limit_bytes=_vmem_limit(vmem_est)),
        cost_estimate=cost,
    )(a_pad, xw_cat, b_cat)


# ---------------------------------------------------------------------------
# GCN backbone over all views that share one adjacency.
# ---------------------------------------------------------------------------
def _gcn_backbone_padded(a_pad, x_views, conv_w, conv_b):
    """a_pad: (Np, Np) bf16 padded normalized adjacency.
    x_views: tuple of (N, F) f32 features, one per view sharing a_pad.
    Returns a list of (N, hid) f32 embeddings, one per view."""
    n_views = len(x_views)
    n = x_views[0].shape[0]
    n_pad = a_pad.shape[0]
    n_layers = len(conv_w)
    tile = min(n_pad, _ROW_TILE)

    dims = [conv_w[0].shape[0]] + [w.shape[1] for w in conv_w]
    pads = [_round_up(d, 128) for d in dims]

    # Pack all views side by side along the lane dim: H_cat = [H1 | H2 | ...].
    f0 = pads[0]
    h_cat = jnp.zeros((n_pad, n_views * f0), jnp.bfloat16)
    for v, xv in enumerate(x_views):
        h_cat = h_cat.at[:n, v * f0:v * f0 + dims[0]].set(
            xv.astype(jnp.bfloat16))

    for i in range(n_layers):
        f_pad, h_pad = pads[i], pads[i + 1]
        w_pad = jnp.zeros((f_pad, h_pad), jnp.bfloat16)
        w_pad = w_pad.at[:dims[i], :dims[i + 1]].set(
            conv_w[i].astype(jnp.bfloat16))
        b_pad = jnp.zeros((1, h_pad), jnp.float32)
        b_pad = b_pad.at[0, :dims[i + 1]].set(conv_b[i])
        b_cat = jnp.tile(b_pad, (1, n_views))

        xw_cat = _feature_transform(h_cat, w_pad, n_views=n_views,
                                    f_pad=f_pad, h_pad=h_pad, tm=tile)
        last = i == n_layers - 1
        h_cat = _aggregate(a_pad, xw_cat, b_cat,
                           apply_relu=not last,
                           out_dtype=jnp.float32 if last else jnp.bfloat16,
                           tm=tile, tk=tile)

    h_last = pads[-1]
    return [h_cat[:n, v * h_last:v * h_last + dims[-1]]
            for v in range(n_views)]


# ---------------------------------------------------------------------------
# Normalized dense adjacency, built directly into the padded bf16 buffer
# (PyG GCNConv semantics: scatter-add edges, add missing self-loops, D^-1/2).
# ---------------------------------------------------------------------------
def normalized_adjacency_padded(edge_index, num_nodes, n_pad):
    src, dst = edge_index[0], edge_index[1]
    a = jnp.zeros((n_pad, n_pad), jnp.float32)
    a = a.at[dst, src].add(1.0)                       # duplicate edges count
    real = jnp.arange(n_pad) < num_nodes
    diag = jnp.diagonal(a)
    a = a + jnp.diag(jnp.where((diag == 0.0) & real, 1.0, 0.0))
    deg = a.sum(axis=1)                               # padded rows stay at 0
    d_inv_sqrt = jnp.where(deg > 0.0, jax.lax.rsqrt(deg), 0.0)
    return (d_inv_sqrt[:, None] * a * d_inv_sqrt[None, :]).astype(jnp.bfloat16)


# ---------------------------------------------------------------------------
# GRACE model (forward = GCN backbone applied to each view).
# ---------------------------------------------------------------------------
def init_grace_params(key, in_dim, hid_dim, proj_hid_dim, n_layers):
    def glorot(k, fan_in, fan_out):
        lim = jnp.sqrt(6.0 / (fan_in + fan_out))
        return jax.random.uniform(k, (fan_in, fan_out), jnp.float32, -lim, lim)

    keys = jax.random.split(key, n_layers + 3)
    dims = [in_dim] + [hid_dim] * n_layers            # GRACE uses out_dim == hid_dim
    conv_w = [glorot(keys[i], dims[i], dims[i + 1]) for i in range(n_layers)]
    conv_b = [jnp.zeros((dims[i + 1],), jnp.float32) for i in range(n_layers)]
    # Projection heads exist in the module but are unused in forward().
    fc1_w = glorot(keys[n_layers], hid_dim, proj_hid_dim)
    fc2_w = glorot(keys[n_layers + 1], proj_hid_dim, hid_dim)
    fc3_w = glorot(keys[n_layers + 2], hid_dim, hid_dim)
    return {
        "conv_w": conv_w,
        "conv_b": conv_b,
        "fc1_w": fc1_w, "fc1_b": jnp.zeros((proj_hid_dim,), jnp.float32),
        "fc2_w": fc2_w, "fc2_b": jnp.zeros((hid_dim,), jnp.float32),
        "fc3_w": fc3_w, "fc3_b": jnp.zeros((hid_dim,), jnp.float32),
    }


@functools.partial(jax.jit, static_argnames=("num_nodes", "n_pad"))
def _forward_shared(conv_w, conv_b, x1, x2, edge_index, *, num_nodes, n_pad):
    a_pad = normalized_adjacency_padded(edge_index, num_nodes, n_pad)
    z1, z2 = _gcn_backbone_padded(a_pad, (x1, x2), conv_w, conv_b)
    return z1, z2


@functools.partial(jax.jit, static_argnames=("num_nodes", "n_pad"))
def _forward_single(conv_w, conv_b, x, edge_index, *, num_nodes, n_pad):
    a_pad = normalized_adjacency_padded(edge_index, num_nodes, n_pad)
    (z,) = _gcn_backbone_padded(a_pad, (x,), conv_w, conv_b)
    return z


def grace_forward(params, x1, edge_index1, x2, edge_index2):
    """GRACE.forward: GCN backbone on both views, returns (z1, z2)."""
    n = x1.shape[0]
    n_pad = _padded_num_nodes(n)
    conv_w, conv_b = params["conv_w"], params["conv_b"]
    # Gate A-dedup / fused views on actual structural equality, not `is`.
    shared = (edge_index1 is edge_index2) or (
        edge_index1.shape == edge_index2.shape
        and bool(jnp.array_equal(edge_index1, edge_index2)))
    if shared:
        return _forward_shared(conv_w, conv_b, x1, x2, edge_index1,
                               num_nodes=n, n_pad=n_pad)
    z1 = _forward_single(conv_w, conv_b, x1, edge_index1,
                         num_nodes=n, n_pad=n_pad)
    z2 = _forward_single(conv_w, conv_b, x2, edge_index2,
                         num_nodes=n, n_pad=n_pad)
    return z1, z2


# ---------------------------------------------------------------------------
if __name__ == "__main__":
    key = jax.random.PRNGKey(0)
    k_param, k_x1, k_x2, k_e = jax.random.split(key, 4)

    N, IN_DIM, HID_DIM, PROJ_HID, N_LAYERS = 16, 8, 32, 32, 2
    E = 24  # directed edges before symmetrization

    params = init_grace_params(k_param, IN_DIM, HID_DIM, PROJ_HID, N_LAYERS)

    x1 = jax.random.normal(k_x1, (N, IN_DIM), jnp.float32)
    x2 = jax.random.normal(k_x2, (N, IN_DIM), jnp.float32)

    e = jax.random.randint(k_e, (2, E), 0, N, jnp.int32)
    # Symmetrize (undirected); both GRACE views share the structure here.
    edge_index = jnp.concatenate([e, jnp.stack([e[1], e[0]], axis=0)], axis=1)

    z1, z2 = grace_forward(params, x1, edge_index, x2, edge_index)
    jax.block_until_ready((z1, z2))

    assert z1.shape == (N, HID_DIM) and z2.shape == (N, HID_DIM)
    assert jnp.all(jnp.isfinite(z1)) and jnp.all(jnp.isfinite(z2))

    # Pure-JAX reference (same bf16-rounded A, f32 math elsewhere).
    a_ref = normalized_adjacency_padded(edge_index, N, N).astype(jnp.float32)

    def ref_backbone(x):
        h = x
        for i in range(N_LAYERS):
            h = a_ref @ (h @ params["conv_w"][i]) + params["conv_b"][i]
            if i < N_LAYERS - 1:
                h = jnp.maximum(h, 0.0)
        return h

    r1, r2 = ref_backbone(x1), ref_backbone(x2)
    assert jnp.allclose(z1, r1, rtol=1e-1, atol=1e-1)
    assert jnp.allclose(z2, r2, rtol=1e-1, atol=1e-1)
    print("KERNEL_OK")
</pallas_src>

<mosaic_0001>
module attributes {stable_mosaic.version = 11 : i64} {
  func.func private @main(%arg0: i32) attributes {dimension_semantics = [#tpu.dimension_semantics<core_parallel>], iteration_bounds = array<i64: 2>, tpu.core_type = #tpu.core_type<sc_scalar_subcore>, window_params = []} {
    return
  }
}

module attributes {stable_mosaic.version = 11 : i64} {
  func.func private @main(%arg0: i32) attributes {dimension_semantics = [#tpu.dimension_semantics<core_parallel>], iteration_bounds = array<i64: 2>, tpu.core_type = #tpu.core_type<sc_scalar_subcore>, window_params = []} {
    return
  }
}

module attributes {stable_mosaic.version = 11 : i64} {
  func.func @_feature_transform_kernel(%arg0: i32, %arg1: memref<128x256xbf16, #tpu.memory_space<vmem>>, %arg2: memref<128x128xbf16, #tpu.memory_space<vmem>>, %arg3: memref<128x256xbf16, #tpu.memory_space<vmem>>) attributes {dimension_semantics = [#tpu.dimension_semantics<parallel>], iteration_bounds = array<i64: 1>, scalar_prefetch = 0 : i64, scratch_operands = 0 : i64, tpu.core_type = #tpu.core_type<tc>, window_params = [{transform_indices = @transform_0, window_bounds = array<i64: 128, 256>}, {pipeline_mode = #tpu.pipeline_mode<synchronous>, transform_indices = @transform_1, window_bounds = array<i64: 128, 128>}, {transform_indices = @transform_2, window_bounds = array<i64: 128, 256>}]} {
    %c0 = arith.constant 0 : index
    %c0_0 = arith.constant 0 : index
    %0 = vector.load %arg2[%c0, %c0_0] : memref<128x128xbf16, #tpu.memory_space<vmem>>, vector<128x128xbf16>
    %c0_1 = arith.constant 0 : index
    %c0_2 = arith.constant 0 : index
    %1 = vector.load %arg1[%c0_1, %c0_2] : memref<128x256xbf16, #tpu.memory_space<vmem>>, vector<128x128xbf16>
    %cst = arith.constant dense<0.000000e+00> : vector<128x128xf32>
    %2 = tpu.matmul %1, %0, %cst {dimension_numbers = #tpu.dot_dimension_numbers<[1], [0], [0], [1], [0, 0, 1, 1], [], []>} : vector<128x128xbf16>, vector<128x128xbf16>, vector<128x128xf32> -> vector<128x128xf32>
    %3 = arith.truncf %2 : vector<128x128xf32> to vector<128x128xbf16>
    %c0_3 = arith.constant 0 : index
    %c0_4 = arith.constant 0 : index
    %4 = vector.load %arg3[%c0_3, %c0_4] : memref<128x256xbf16, #tpu.memory_space<vmem>>, vector<128x128xbf16>
    tpu.vector_store %arg3[%c0_3, %c0_4], %3 {strides = array<i32>} : memref<128x256xbf16, #tpu.memory_space<vmem>>, vector<128x128xbf16>,
    %c0_5 = arith.constant 0 : index
    %c128 = arith.constant 128 : index
    %5 = vector.load %arg1[%c0_5, %c128] : memref<128x256xbf16, #tpu.memory_space<vmem>>, vector<128x128xbf16>
    %cst_6 = arith.constant dense<0.000000e+00> : vector<128x128xf32>
    %6 = tpu.matmul %5, %0, %cst_6 {dimension_numbers = #tpu.dot_dimension_numbers<[1], [0], [0], [1], [0, 0, 1, 1], [], []>} : vector<128x128xbf16>, vector<128x128xbf16>, vector<128x128xf32> -> vector<128x128xf32>
    %7 = arith.truncf %6 : vector<128x128xf32> to vector<128x128xbf16>
    %c0_7 = arith.constant 0 : index
    %c128_8 = arith.constant 128 : index
    %8 = vector.load %arg3[%c0_7, %c128_8] : memref<128x256xbf16, #tpu.memory_space<vmem>>, vector<128x128xbf16>
    tpu.vector_store %arg3[%c0_7, %c128_8], %7 {strides = array<i32>} : memref<128x256xbf16, #tpu.memory_space<vmem>>, vector<128x128xbf16>,
    return
  }
  func.func @transform_0(%arg0: i32) -> (i32, i32) {
    %c0_i32 = arith.constant 0 : i32
    %c0_i32_0 = arith.constant 0 : i32
    return %arg0, %c0_i32 : i32, i32
  }
  func.func @transform_1(%arg0: i32) -> (i32, i32) {
    %c0_i32 = arith.constant 0 : i32
    %c0_i32_0 = arith.constant 0 : i32
    %c0_i32_1 = arith.constant 0 : i32
    return %c0_i32, %c0_i32_0 : i32, i32
  }
  func.func @transform_2(%arg0: i32) -> (i32, i32) {
    %c0_i32 = arith.constant 0 : i32
    %c0_i32_0 = arith.constant 0 : i32
    return %arg0, %c0_i32 : i32, i32
  }
}

module attributes {stable_mosaic.version = 11 : i64} {
  func.func @_aggregate_kernel(%arg0: i32, %arg1: i32, %arg2: memref<128x128xbf16, #tpu.memory_space<vmem>>, %arg3: memref<128x256xbf16, #tpu.memory_space<vmem>>, %arg4: memref<1x256xf32, #tpu.memory_space<vmem>>, %arg5: memref<128x256xbf16, #tpu.memory_space<vmem>>, %arg6: memref<128x256xf32, #tpu.memory_space<vmem>>) attributes {dimension_semantics = [#tpu.dimension_semantics<parallel>, #tpu.dimension_semantics<arbitrary>], iteration_bounds = array<i64: 1, 1>, scalar_prefetch = 0 : i64, scratch_operands = 1 : i64, tpu.core_type = #tpu.core_type<tc>, window_params = [{transform_indices = @transform_0, window_bounds = array<i64: 128, 128>}, {transform_indices = @transform_1, window_bounds = array<i64: 128, 256>}, {pipeline_mode = #tpu.pipeline_mode<synchronous>, transform_indices = @transform_2, window_bounds = array<i64: 1, 256>}, {transform_indices = @transform_3, window_bounds = array<i64: 128, 256>}]} {
    %c0_i32 = arith.constant 0 : i32
    %0 = arith.cmpi eq, %arg1, %c0_i32 : i32
    %1 = arith.extui %0 : i1 to i32
    %c0_i32_0 = arith.constant 0 : i32
    %2 = arith.cmpi ne, %1, %c0_i32_0 : i32
    scf.if %2 {
      %cst_10 = arith.constant 0.000000e+00 : f32
      %12 = vector.broadcast %cst_10 : f32 to vector<128x256xf32>
      %c0_11 = arith.constant 0 : index
      %c0_12 = arith.constant 0 : index
      %13 = vector.load %arg6[%c0_11, %c0_12] : memref<128x256xf32, #tpu.memory_space<vmem>>, vector<128x256xf32>
      tpu.vector_store %arg6[%c0_11, %c0_12], %12 {strides = array<i32>} : memref<128x256xf32, #tpu.memory_space<vmem>>, vector<128x256xf32>,
    } else {
    }
    %c0 = arith.constant 0 : index
    %c0_1 = arith.constant 0 : index
    %3 = vector.load %arg6[%c0, %c0_1] : memref<128x256xf32, #tpu.memory_space<vmem>>, vector<128x256xf32>
    %c0_2 = arith.constant 0 : index
    %c0_3 = arith.constant 0 : index
    %4 = vector.load %arg2[%c0_2, %c0_3] : memref<128x128xbf16, #tpu.memory_space<vmem>>, vector<128x128xbf16>
    %c0_4 = arith.constant 0 : index
    %c0_5 = arith.constant 0 : index
    %5 = vector.load %arg3[%c0_4, %c0_5] : memref<128x256xbf16, #tpu.memory_space<vmem>>, vector<128x256xbf16>
    %cst = arith.constant dense<0.000000e+00> : vector<128x256xf32>
    %6 = tpu.matmul %4, %5, %cst {dimension_numbers = #tpu.dot_dimension_numbers<[1], [0], [0], [1], [0, 0, 1, 1], [], []>} : vector<128x128xbf16>, vector<128x256xbf16>, vector<128x256xf32> -> vector<128x256xf32>
    %7 = arith.addf %3, %6 : vector<128x256xf32>
    %c0_6 = arith.constant 0 : index
    %c0_7 = arith.constant 0 : index
    %8 = vector.load %arg6[%c0_6, %c0_7] : memref<128x256xf32, #tpu.memory_space<vmem>>, vector<128x256xf32>
    tpu.vector_store %arg6[%c0_6, %c0_7], %7 {strides = array<i32>} : memref<128x256xf32, #tpu.memory_space<vmem>>, vector<128x256xf32>,
    %c0_i32_8 = arith.constant 0 : i32
    %9 = arith.cmpi eq, %arg1, %c0_i32_8 : i32
    %10 = arith.extui %9 : i1 to i32
    %c0_i32_9 = arith.constant 0 : i32
    %11 = arith.cmpi ne, %10, %c0_i32_9 : i32
    scf.if %11 {
      %c0_10 = arith.constant 0 : index
      %c0_11 = arith.constant 0 : index
      %12 = vector.load %arg6[%c0_10, %c0_11] : memref<128x256xf32, #tpu.memory_space<vmem>>, vector<128x256xf32>
      %c0_12 = arith.constant 0 : index
      %c0_13 = arith.constant 0 : index
      %13 = vector.load %arg4[%c0_12, %c0_13] : memref<1x256xf32, #tpu.memory_space<vmem>>, vector<1x256xf32>
      %14 = vector.broadcast %13 : vector<1x256xf32> to vector<128x256xf32>
      %15 = arith.addf %12, %14 : vector<128x256xf32>
      %cst_14 = arith.constant 0.000000e+00 : f32
      %16 = vector.broadcast %cst_14 : f32 to vector<128x256xf32>
      %17 = arith.maximumf %15, %16 : vector<128x256xf32>
      %18 = arith.truncf %17 : vector<128x256xf32> to vector<128x256xbf16>
      %c0_15 = arith.constant 0 : index
      %c0_16 = arith.constant 0 : index
      %19 = vector.load %arg5[%c0_15, %c0_16] : memref<128x256xbf16, #tpu.memory_space<vmem>>, vector<128x256xbf16>
      tpu.vector_store %arg5[%c0_15, %c0_16], %18 {strides = array<i32>} : memref<128x256xbf16, #tpu.memory_space<vmem>>, vector<128x256xbf16>,
    } else {
    }
    return
  }
  func.func @transform_0(%arg0: i32, %arg1: i32) -> (i32, i32) {
    %c0_i32 = arith.constant 0 : i32
    return %arg0, %arg1 : i32, i32
  }
  func.func @transform_1(%arg0: i32, %arg1: i32) -> (i32, i32) {
    %c0_i32 = arith.constant 0 : i32
    %c0_i32_0 = arith.constant 0 : i32
    return %arg1, %c0_i32 : i32, i32
  }
  func.func @transform_2(%arg0: i32, %arg1: i32) -> (i32, i32) {
    %c0_i32 = arith.constant 0 : i32
    %c0_i32_0 = arith.constant 0 : i32
    %c0_i32_1 = arith.constant 0 : i32
    return %c0_i32, %c0_i32_0 : i32, i32
  }
  func.func @transform_3(%arg0: i32, %arg1: i32) -> (i32, i32) {
    %c0_i32 = arith.constant 0 : i32
    %c0_i32_0 = arith.constant 0 : i32
    return %arg0, %c0_i32 : i32, i32
  }
}

module attributes {stable_mosaic.version = 11 : i64} {
  func.func @_aggregate_kernel(%arg0: i32, %arg1: i32, %arg2: memref<128x128xbf16, #tpu.memory_space<vmem>>, %arg3: memref<128x256xbf16, #tpu.memory_space<vmem>>, %arg4: memref<1x256xf32, #tpu.memory_space<vmem>>, %arg5: memref<128x256xf32, #tpu.memory_space<vmem>>, %arg6: memref<128x256xf32, #tpu.memory_space<vmem>>) attributes {dimension_semantics = [#tpu.dimension_semantics<parallel>, #tpu.dimension_semantics<arbitrary>], iteration_bounds = array<i64: 1, 1>, scalar_prefetch = 0 : i64, scratch_operands = 1 : i64, tpu.core_type = #tpu.core_type<tc>, window_params = [{transform_indices = @transform_0, window_bounds = array<i64: 128, 128>}, {transform_indices = @transform_1, window_bounds = array<i64: 128, 256>}, {pipeline_mode = #tpu.pipeline_mode<synchronous>, transform_indices = @transform_2, window_bounds = array<i64: 1, 256>}, {transform_indices = @transform_3, window_bounds = array<i64: 128, 256>}]} {
    %c0_i32 = arith.constant 0 : i32
    %0 = arith.cmpi eq, %arg1, %c0_i32 : i32
    %1 = arith.extui %0 : i1 to i32
    %c0_i32_0 = arith.constant 0 : i32
    %2 = arith.cmpi ne, %1, %c0_i32_0 : i32
    scf.if %2 {
      %cst_10 = arith.constant 0.000000e+00 : f32
      %12 = vector.broadcast %cst_10 : f32 to vector<128x256xf32>
      %c0_11 = arith.constant 0 : index
      %c0_12 = arith.constant 0 : index
      %13 = vector.load %arg6[%c0_11, %c0_12] : memref<128x256xf32, #tpu.memory_space<vmem>>, vector<128x256xf32>
      tpu.vector_store %arg6[%c0_11, %c0_12], %12 {strides = array<i32>} : memref<128x256xf32, #tpu.memory_space<vmem>>, vector<128x256xf32>,
    } else {
    }
    %c0 = arith.constant 0 : index
    %c0_1 = arith.constant 0 : index
    %3 = vector.load %arg6[%c0, %c0_1] : memref<128x256xf32, #tpu.memory_space<vmem>>, vector<128x256xf32>
    %c0_2 = arith.constant 0 : index
    %c0_3 = arith.constant 0 : index
    %4 = vector.load %arg2[%c0_2, %c0_3] : memref<128x128xbf16, #tpu.memory_space<vmem>>, vector<128x128xbf16>
    %c0_4 = arith.constant 0 : index
    %c0_5 = arith.constant 0 : index
    %5 = vector.load %arg3[%c0_4, %c0_5] : memref<128x256xbf16, #tpu.memory_space<vmem>>, vector<128x256xbf16>
    %cst = arith.constant dense<0.000000e+00> : vector<128x256xf32>
    %6 = tpu.matmul %4, %5, %cst {dimension_numbers = #tpu.dot_dimension_numbers<[1], [0], [0], [1], [0, 0, 1, 1], [], []>} : vector<128x128xbf16>, vector<128x256xbf16>, vector<128x256xf32> -> vector<128x256xf32>
    %7 = arith.addf %3, %6 : vector<128x256xf32>
    %c0_6 = arith.constant 0 : index
    %c0_7 = arith.constant 0 : index
    %8 = vector.load %arg6[%c0_6, %c0_7] : memref<128x256xf32, #tpu.memory_space<vmem>>, vector<128x256xf32>
    tpu.vector_store %arg6[%c0_6, %c0_7], %7 {strides = array<i32>} : memref<128x256xf32, #tpu.memory_space<vmem>>, vector<128x256xf32>,
    %c0_i32_8 = arith.constant 0 : i32
    %9 = arith.cmpi eq, %arg1, %c0_i32_8 : i32
    %10 = arith.extui %9 : i1 to i32
    %c0_i32_9 = arith.constant 0 : i32
    %11 = arith.cmpi ne, %10, %c0_i32_9 : i32
    scf.if %11 {
      %c0_10 = arith.constant 0 : index
      %c0_11 = arith.constant 0 : index
      %12 = vector.load %arg6[%c0_10, %c0_11] : memref<128x256xf32, #tpu.memory_space<vmem>>, vector<128x256xf32>
      %c0_12 = arith.constant 0 : index
      %c0_13 = arith.constant 0 : index
      %13 = vector.load %arg4[%c0_12, %c0_13] : memref<1x256xf32, #tpu.memory_space<vmem>>, vector<1x256xf32>
      %14 = vector.broadcast %13 : vector<1x256xf32> to vector<128x256xf32>
      %15 = arith.addf %12, %14 : vector<128x256xf32>
      %c0_14 = arith.constant 0 : index
      %c0_15 = arith.constant 0 : index
      %16 = vector.load %arg5[%c0_14, %c0_15] : memref<128x256xf32, #tpu.memory_space<vmem>>, vector<128x256xf32>
      tpu.vector_store %arg5[%c0_14, %c0_15], %15 {strides = array<i32>} : memref<128x256xf32, #tpu.memory_space<vmem>>, vector<128x256xf32>,
    } else {
    }
    return
  }
  func.func @transform_0(%arg0: i32, %arg1: i32) -> (i32, i32) {
    %c0_i32 = arith.constant 0 : i32
    return %arg0, %arg1 : i32, i32
  }
  func.func @transform_1(%arg0: i32, %arg1: i32) -> (i32, i32) {
    %c0_i32 = arith.constant 0 : i32
    %c0_i32_0 = arith.constant 0 : i32
    return %arg1, %c0_i32 : i32, i32
  }
  func.func @transform_2(%arg0: i32, %arg1: i32) -> (i32, i32) {
    %c0_i32 = arith.constant 0 : i32
    %c0_i32_0 = arith.constant 0 : i32
    %c0_i32_1 = arith.constant 0 : i32
    return %c0_i32, %c0_i32_0 : i32, i32
  }
  func.func @transform_3(%arg0: i32, %arg1: i32) -> (i32, i32) {
    %c0_i32 = arith.constant 0 : i32
    %c0_i32_0 = arith.constant 0 : i32
    return %arg0, %c0_i32 : i32, i32
  }
}

</mosaic_0001>

<bundles_post_ra>
// kernel: _forward_shared.4
= control target key start
LH: loop header
LB: loop body
LE: loop exit
PB: predicated region body
PF: predicated region fallthrough
CT: control target
= control target key end

     0   :  { %s953_s1 = inlined_call_operand.vmem [shape: bf16[128,128], index: 1, kind: input, shape index: {}]   ;;  %s954_s0 = inlined_call_operand.vmem [shape: bf16[128,256], index: 0, kind: input, shape index: {}]   ;;  %s955_s2 = inlined_call_operand.vmem [shape: bf16[128,256], index: 2, kind: output, shape index: {}]  }
   0x1   :  { %v746_v0 = vld [vmem:[%s953_s1 + $0x38] sm:$0xff]   ;;  %v747_v1 = vld [vmem:[%s953_s1 + $0x30] sm:$0xff]   ;;  %v748_v2 = vld [vmem:[%s953_s1 + $0x28] sm:$0xff]  }
   0x2   :  { %682 = vmatprep.subr.bf16.mxu0 %v746_v0  ;;  %714 = vmatprep.subr.bf16.mxu1 %v746_v0  ;;  %v749_v3 = vld [vmem:[%s953_s1 + $0x20] sm:$0xff]   ;;  %v750_v6 = vld [vmem:[%s953_s1 + $0x18] sm:$0xff]   ;;  %v751_v7 = vld [vmem:[%s953_s1 + $0x10] sm:$0xff]  }
   0x3   :  { %683 = vmatpush3.bf16.msra.mxu0 %v746_v0  ;;  %715 = vmatpush3.bf16.msra.mxu1 %v746_v0  ;;  %v754_v4 = vld [vmem:[%s954_s0] ss:$8 sps:$4 sm:$0xff]   ;;  %v755_v5 = vld [vmem:[%s954_s0 + $0x4] ss:$8 sps:$4 sm:$0xff]   ;;  %v756_v10 = vld [vmem:[%s954_s0 + $0x10] ss:$8 sps:$4 sm:$0xff]  }
   0x4   :  { %684 = vmatprep.subr.bf16.mxu0 %v747_v1  ;;  %716 = vmatprep.subr.bf16.mxu1 %v747_v1  ;;  %v752_v8 = vld [vmem:[%s953_s1 + $0x8] sm:$0xff]   ;;  %v753_v9 = vld [vmem:[%s953_s1] sm:$0xff]   ;;  %v757_v11 = vld [vmem:[%s954_s0 + $0x14] ss:$8 sps:$4 sm:$0xff]  }
   0x5   :  { %698 = vmatprep.mubr.bf16.mxu0 %v754_v4  ;;  %730 = vmatprep.mubr.bf16.mxu1 %v755_v5  ;;  %v758_v12 = vld [vmem:[%s954_s0 + $0x20] ss:$8 sps:$4 sm:$0xff]   ;;  %v759_v13 = vld [vmem:[%s954_s0 + $0x24] ss:$8 sps:$4 sm:$0xff]   ;;  %v760_v14 = vld [vmem:[%s954_s0 + $0x30] ss:$8 sps:$4 sm:$0xff]  }
   0x6   :  { %v761_v15 = vld [vmem:[%s954_s0 + $0x34] ss:$8 sps:$4 sm:$0xff]   ;;  %v762_v16 = vld [vmem:[%s954_s0 + $0x40] ss:$8 sps:$4 sm:$0xff]   ;;  %v763_v17 = vld [vmem:[%s954_s0 + $0x44] ss:$8 sps:$4 sm:$0xff]  }
   0x7   :  { %685 = vmatpush3.bf16.msra.mxu0 %v747_v1  ;;  %717 = vmatpush3.bf16.msra.mxu1 %v747_v1  ;;  %v764_v18 = vld [vmem:[%s954_s0 + $0x50] ss:$8 sps:$4 sm:$0xff]   ;;  %v765_v19 = vld [vmem:[%s954_s0 + $0x54] ss:$8 sps:$4 sm:$0xff]   ;;  %v766_v20 = vld [vmem:[%s954_s0 + $0x60] ss:$8 sps:$4 sm:$0xff]  }
   0x8   :  { %686 = vmatprep.subr.bf16.mxu0 %v748_v2  ;;  %718 = vmatprep.subr.bf16.mxu1 %v748_v2  ;;  %v767_v21 = vld [vmem:[%s954_s0 + $0x64] ss:$8 sps:$4 sm:$0xff]   ;;  %v768_v22 = vld [vmem:[%s954_s0 + $0x70] ss:$8 sps:$4 sm:$0xff]   ;;  %v769_v23 = vld [vmem:[%s954_s0 + $0x74] ss:$8 sps:$4 sm:$0xff]  }
   0xb   :  { %687 = vmatpush3.bf16.msra.mxu0 %v748_v2  ;;  %719 = vmatpush3.bf16.msra.mxu1 %v748_v2 }
   0xc   :  { %688 = vmatprep.subr.bf16.mxu0 %v749_v3  ;;  %720 = vmatprep.subr.bf16.mxu1 %v749_v3 }
   0xf   :  { %689 = vmatpush3.bf16.msra.mxu0 %v749_v3  ;;  %721 = vmatpush3.bf16.msra.mxu1 %v749_v3 }
  0x10   :  { %690 = vmatprep.subr.bf16.mxu0 %v750_v6  ;;  %722 = vmatprep.subr.bf16.mxu1 %v750_v6 }
  0x13   :  { %691 = vmatpush3.bf16.msra.mxu0 %v750_v6  ;;  %723 = vmatpush3.bf16.msra.mxu1 %v750_v6 }
  0x14   :  { %692 = vmatprep.subr.bf16.mxu0 %v751_v7  ;;  %724 = vmatprep.subr.bf16.mxu1 %v751_v7 }
  0x17   :  { %693 = vmatpush3.bf16.msra.mxu0 %v751_v7  ;;  %725 = vmatpush3.bf16.msra.mxu1 %v751_v7 }
  0x18   :  { %694 = vmatprep.subr.bf16.mxu0 %v752_v8  ;;  %726 = vmatprep.subr.bf16.mxu1 %v752_v8 }
  0x1b   :  { %695 = vmatpush3.bf16.msra.mxu0 %v752_v8  ;;  %727 = vmatpush3.bf16.msra.mxu1 %v752_v8 }
  0x1c   :  { %696 = vmatprep.subr.bf16.mxu0 %v753_v9  ;;  %728 = vmatprep.subr.bf16.mxu1 %v753_v9 }
  0x1f   :  { %697 = vmatpush3.bf16.msra.mxu0 %v753_v9  ;;  %729 = vmatpush3.bf16.msra.mxu1 %v753_v9 }
  0x22   :  { %699 = vmatmul.mubr.bf16.vlgmr.msra.gmra.mxu0 %v756_v10  ;;  %731 = vmatmul.mubr.bf16.vlgmr.msra.gmra.mxu1 %v757_v11 }
  0x23   :  { %702 = vmatprep.mubr.bf16.mxu0 %v758_v12  ;;  %734 = vmatprep.mubr.bf16.mxu1 %v759_v13 }
  0x2a   :  { %703 = vmatmul.mubr.bf16.gmra.mxu0 %v760_v14  ;;  %735 = vmatmul.mubr.bf16.gmra.mxu1 %v761_v15 }
  0x2b   :  { %706 = vmatprep.mubr.bf16.mxu0 %v762_v16  ;;  %738 = vmatprep.mubr.bf16.mxu1 %v763_v17 }
  0x32   :  { %707 = vmatmul.mubr.bf16.gmra.mxu0 %v764_v18  ;;  %739 = vmatmul.mubr.bf16.gmra.mxu1 %v765_v19 }
  0x33   :  { %710 = vmatprep.mubr.bf16.mxu0 %v766_v20  ;;  %742 = vmatprep.mubr.bf16.mxu1 %v767_v21 }
  0x3a   :  { %711 = vmatmul.mubr.bf16.gmra.mxu0 %v768_v22  ;;  %743 = vmatmul.mubr.bf16.gmra.mxu1 %v769_v23 }
  0xe2   :  { %v700_v24 = vpop.f32.mrf.mxu0  ;;  %v732_v25 = vpop.f32.mrf.mxu1 }
  0xe3   :  { %v620_v26 = vpack.c.bf16 %v700_v24, %v700_v24  ;;  %v636_v27 = vpack.c.bf16 %v732_v25, %v732_v25 }
  0xe4   :  { %v174_v28 = vpop.f32.mrf.mxu0  ;;  %v415_v29 = vpop.f32.mrf.mxu1 }
  0xe5   :  { %303 = vst [vmem:[%s955_s2 + $0x10] sm:$0xf] %v620_v26  ;;  %544 = vst [vmem:[%s955_s2 + $0x14] sm:$0xf] %v636_v27  ;;  %v618_v30 = vpack.c.bf16 %v174_v28, %v174_v28  ;;  %v634_v31 = vpack.c.bf16 %v415_v29, %v415_v29 }
  0xe6   :  { %v701_v32 = vpop.f32.mrf.mxu0  ;;  %v733_v33 = vpop.f32.mrf.mxu1 }
  0xe7   :  { %301 = vst [vmem:[%s955_s2] sm:$0xf] %v618_v30  ;;  %542 = vst [vmem:[%s955_s2 + $0x4] sm:$0xf] %v634_v31  ;;  %v621_v34 = vpack.c.bf16 %v701_v32, %v701_v32  ;;  %v637_v35 = vpack.c.bf16 %v733_v33, %v733_v33 }
  0xe8   :  { %v177_v36 = vpop.f32.mrf.mxu0  ;;  %v418_v37 = vpop.f32.mrf.mxu1 }
  0xe9   :  { %304 = vst [vmem:[%s955_s2 + $0x18] sm:$0xf] %v621_v34  ;;  %545 = vst [vmem:[%s955_s2 + $0x1c] sm:$0xf] %v637_v35  ;;  %v619_v38 = vpack.c.bf16 %v177_v36, %v177_v36  ;;  %v635_v39 = vpack.c.bf16 %v418_v37, %v418_v37 }
  0xea   :  { %v704_v40 = vpop.f32.mrf.mxu0  ;;  %v736_v41 = vpop.f32.mrf.mxu1 }
  0xeb   :  { %302 = vst [vmem:[%s955_s2 + $0x8] sm:$0xf] %v619_v38  ;;  %543 = vst [vmem:[%s955_s2 + $0xc] sm:$0xf] %v635_v39  ;;  %v624_v42 = vpack.c.bf16 %v704_v40, %v704_v40  ;;  %v640_v43 = vpack.c.bf16 %v736_v41, %v736_v41 }
  0xec   :  { %v190_v44 = vpop.f32.mrf.mxu0  ;;  %v431_v45 = vpop.f32.mrf.mxu1 }
  0xed   :  { %307 = vst [vmem:[%s955_s2 + $0x30] sm:$0xf] %v624_v42  ;;  %548 = vst [vmem:[%s955_s2 + $0x34] sm:$0xf] %v640_v43  ;;  %v622_v46 = vpack.c.bf16 %v190_v44, %v190_v44  ;;  %v638_v47 = vpack.c.bf16 %v431_v45, %v431_v45 }
  0xee   :  { %v705_v48 = vpop.f32.mrf.mxu0  ;;  %v737_v49 = vpop.f32.mrf.mxu1 }
  0xef   :  { %305 = vst [vmem:[%s955_s2 + $0x20] sm:$0xf] %v622_v46  ;;  %546 = vst [vmem:[%s955_s2 + $0x24] sm:$0xf] %v638_v47  ;;  %v625_v50 = vpack.c.bf16 %v705_v48, %v705_v48  ;;  %v641_v51 = vpack.c.bf16 %v737_v49, %v737_v49 }
  0xf0   :  { %v193_v52 = vpop.f32.mrf.mxu0  ;;  %v434_v53 = vpop.f32.mrf.mxu1 }
  0xf1   :  { %308 = vst [vmem:[%s955_s2 + $0x38] sm:$0xf] %v625_v50  ;;  %549 = vst [vmem:[%s955_s2 + $0x3c] sm:$0xf] %v641_v51  ;;  %v623_v54 = vpack.c.bf16 %v193_v52, %v193_v52  ;;  %v639_v55 = vpack.c.bf16 %v434_v53, %v434_v53 }
  0xf2   :  { %v708_v56 = vpop.f32.mrf.mxu0  ;;  %v740_v57 = vpop.f32.mrf.mxu1 }
  0xf3   :  { %306 = vst [vmem:[%s955_s2 + $0x28] sm:$0xf] %v623_v54  ;;  %547 = vst [vmem:[%s955_s2 + $0x2c] sm:$0xf] %v639_v55  ;;  %v628_v58 = vpack.c.bf16 %v708_v56, %v708_v56  ;;  %v644_v59 = vpack.c.bf16 %v740_v57, %v740_v57 }
  0xf4   :  { %v206_v60 = vpop.f32.mrf.mxu0  ;;  %v447_v61 = vpop.f32.mrf.mxu1 }
  0xf5   :  { %311 = vst [vmem:[%s955_s2 + $0x50] sm:$0xf] %v628_v58  ;;  %552 = vst [vmem:[%s955_s2 + $0x54] sm:$0xf] %v644_v59  ;;  %v626_v62 = vpack.c.bf16 %v206_v60, %v206_v60  ;;  %v642_v63 = vpack.c.bf16 %v447_v61, %v447_v61 }
  0xf6   :  { %v709_v0 = vpop.f32.mrf.mxu0  ;;  %v741_v1 = vpop.f32.mrf.mxu1 }
  0xf7   :  { %309 = vst [vmem:[%s955_s2 + $0x40] sm:$0xf] %v626_v62  ;;  %550 = vst [vmem:[%s955_s2 + $0x44] sm:$0xf] %v642_v63  ;;  %v629_v2 = vpack.c.bf16 %v709_v0, %v709_v0  ;;  %v645_v3 = vpack.c.bf16 %v741_v1, %v741_v1 }
  0xf8   :  { %v209_v4 = vpop.f32.mrf.mxu0  ;;  %v450_v5 = vpop.f32.mrf.mxu1 }
  0xf9   :  { %312 = vst [vmem:[%s955_s2 + $0x58] sm:$0xf] %v629_v2  ;;  %553 = vst [vmem:[%s955_s2 + $0x5c] sm:$0xf] %v645_v3  ;;  %v627_v6 = vpack.c.bf16 %v209_v4, %v209_v4  ;;  %v643_v7 = vpack.c.bf16 %v450_v5, %v450_v5 }
  0xfa   :  { %v712_v8 = vpop.f32.mrf.mxu0  ;;  %v744_v9 = vpop.f32.mrf.mxu1 }
  0xfb   :  { %310 = vst [vmem:[%s955_s2 + $0x48] sm:$0xf] %v627_v6  ;;  %551 = vst [vmem:[%s955_s2 + $0x4c] sm:$0xf] %v643_v7  ;;  %v632_v10 = vpack.c.bf16 %v712_v8, %v712_v8  ;;  %v648_v11 = vpack.c.bf16 %v744_v9, %v744_v9 }
  0xfc   :  { %v222_v12 = vpop.f32.mrf.mxu0  ;;  %v463_v13 = vpop.f32.mrf.mxu1 }
  0xfd   :  { %315 = vst [vmem:[%s955_s2 + $0x70] sm:$0xf] %v632_v10  ;;  %556 = vst [vmem:[%s955_s2 + $0x74] sm:$0xf] %v648_v11  ;;  %v630_v14 = vpack.c.bf16 %v222_v12, %v222_v12  ;;  %v646_v15 = vpack.c.bf16 %v463_v13, %v463_v13 }
  0xfe   :  { %v713_v16 = vpop.f32.mrf.mxu0  ;;  %v745_v17 = vpop.f32.mrf.mxu1 }
  0xff   :  { %313 = vst [vmem:[%s955_s2 + $0x60] sm:$0xf] %v630_v14  ;;  %554 = vst [vmem:[%s955_s2 + $0x64] sm:$0xf] %v646_v15  ;;  %v633_v18 = vpack.c.bf16 %v713_v16, %v713_v16  ;;  %v649_v19 = vpack.c.bf16 %v745_v17, %v745_v17 }
 0x100   :  { %v225_v20 = vpop.f32.mrf.mxu0  ;;  %v466_v21 = vpop.f32.mrf.mxu1 }
 0x101   :  { %316 = vst [vmem:[%s955_s2 + $0x78] sm:$0xf] %v633_v18  ;;  %557 = vst [vmem:[%s955_s2 + $0x7c] sm:$0xf] %v649_v19  ;;  %v631_v22 = vpack.c.bf16 %v225_v20, %v225_v20  ;;  %v647_v23 = vpack.c.bf16 %v466_v21, %v466_v21 }
 0x103   :  { %314 = vst [vmem:[%s955_s2 + $0x68] sm:$0xf] %v631_v22  ;;  %555 = vst [vmem:[%s955_s2 + $0x6c] sm:$0xf] %v647_v23 }

// kernel: _forward_shared.5
= control target key start
LH: loop header
LB: loop body
LE: loop exit
PB: predicated region body
PF: predicated region fallthrough
CT: control target
= control target key end

     0   :  { %v752_v1 = vmov 0   ;;  %v457_v25 = vlaneseq  ;;  %s940_s1 = inlined_call_operand.vmem [shape: bf16[128,256], index: 1, kind: input, shape index: {}]   ;;  %s941_s0 = inlined_call_operand.vmem [shape: bf16[128,128], index: 0, kind: input, shape index: {}]   ;;  %s942_s2 = inlined_call_operand.vmem [shape: f32[1,256], index: 2, kind: input, shape index: {}]   ;;  %s943_s3 = inlined_call_operand.vmem [shape: bf16[128,256], index: 3, kind: output, shape index: {}]  }
   0x1   :  { %v720_v0 = vld [vmem:[%s940_s1 + $0x74] ss:$8 sps:$4 sm:$0xff]   ;;  %275 = vmatprep.mubr.bf16.mxu0 %v752_v1  ;;  %315 = vmatprep.mubr.bf16.mxu1 %v752_v1  ;;  %v722_v2 = vld [vmem:[%s940_s1 + $0x70] ss:$8 sps:$4 sm:$0xff]   ;;  %v723_v3 = vld [vmem:[%s940_s1 + $0x64] ss:$8 sps:$4 sm:$0xff]  }
   0x2   :  { %243 = vmatprep.subr.bf16.mxu0 %v720_v0  ;;  %703 = vmatprep.subr.bf16.mxu1 %v720_v0  ;;  %v725_v4 = vld [vmem:[%s940_s1 + $0x60] ss:$8 sps:$4 sm:$0xff]   ;;  %v726_v5 = vld [vmem:[%s940_s1 + $0x54] ss:$8 sps:$4 sm:$0xff]   ;;  %v728_v6 = vld [vmem:[%s940_s1 + $0x50] ss:$8 sps:$4 sm:$0xff]  }
   0x3   :  { %244 = vmatpush1.bf16.msra.mxu0 %v722_v2  ;;  %711 = vmatpush1.bf16.msra.mxu1 %v722_v2  ;;  %v729_v7 = vld [vmem:[%s940_s1 + $0x44] ss:$8 sps:$4 sm:$0xff]   ;;  %v731_v8 = vld [vmem:[%s940_s1 + $0x40] ss:$8 sps:$4 sm:$0xff]   ;;  %v732_v9 = vld [vmem:[%s940_s1 + $0x34] ss:$8 sps:$4 sm:$0xff]  }
   0x4   :  { %245 = vmatprep.subr.bf16.mxu0 %v723_v3  ;;  %704 = vmatprep.subr.bf16.mxu1 %v723_v3  ;;  %v734_v10 = vld [vmem:[%s940_s1 + $0x30] ss:$8 sps:$4 sm:$0xff]   ;;  %v735_v11 = vld [vmem:[%s940_s1 + $0x24] ss:$8 sps:$4 sm:$0xff]   ;;  %v737_v12 = vld [vmem:[%s940_s1 + $0x20] ss:$8 sps:$4 sm:$0xff]  }
   0x5   :  { %v738_v13 = vld [vmem:[%s940_s1 + $0x14] ss:$8 sps:$4 sm:$0xff]   ;;  %v740_v14 = vld [vmem:[%s940_s1 + $0x10] ss:$8 sps:$4 sm:$0xff]   ;;  %v741_v15 = vld [vmem:[%s940_s1 + $0x4] ss:$8 sps:$4 sm:$0xff]  }
   0x6   :  { %v743_v16 = vld [vmem:[%s940_s1] ss:$8 sps:$4 sm:$0xff]   ;;  %v748_v21 = vld [vmem:[%s941_s0 + $0x10] sm:$0xff]   ;;  %v750_v23 = vld [vmem:[%s941_s0 + $0x18] sm:$0xff]   ;;  %v458_v26 = vshrl.u32 %v457_v25, 7 }
   0x7   :  { %246 = vmatpush1.bf16.msra.mxu0 %v725_v4  ;;  %712 = vmatpush1.bf16.msra.mxu1 %v725_v4  ;;  %v744_v17 = vld [vmem:[%s941_s0] sm:$0xff]   ;;  %v746_v19 = vld [vmem:[%s941_s0 + $0x8] sm:$0xff]   ;;  %v749_v22 = vld [vmem:[%s941_s0 + $0x30] sm:$0xff]  }
   0x8   :  { %247 = vmatprep.subr.bf16.mxu0 %v726_v5  ;;  %705 = vmatprep.subr.bf16.mxu1 %v726_v5  ;;  %v745_v18 = vld [vmem:[%s941_s0 + $0x20] sm:$0xff]   ;;  %v747_v20 = vld [vmem:[%s941_s0 + $0x28] sm:$0xff]   ;;  %v751_v24 = vld [vmem:[%s941_s0 + $0x38] sm:$0xff]   ;;  %v459_v27 = vsub.s32 0, %v458_v26  ;;  %v463_v29 = vsub.s32 1, %v458_v26 }
   0x9   :  { %v455_v28 = vld [vmem:[%s942_s2] sm:$0x3] }
   0xa   :  { %v856_v30 = vrot.slane %v455_v28, %v459_v27  ;;  %v858_v31 = vrot.slane %v455_v28, %v463_v29 }
   0xb   :  { %248 = vmatpush1.bf16.msra.mxu0 %v728_v6  ;;  %713 = vmatpush1.bf16.msra.mxu1 %v728_v6 }
   0xc   :  { %249 = vmatprep.subr.bf16.mxu0 %v729_v7  ;;  %706 = vmatprep.subr.bf16.mxu1 %v729_v7 }
   0xf   :  { %250 = vmatpush1.bf16.msra.mxu0 %v731_v8  ;;  %714 = vmatpush1.bf16.msra.mxu1 %v731_v8 }
  0x10   :  { %251 = vmatprep.subr.bf16.mxu0 %v732_v9  ;;  %707 = vmatprep.subr.bf16.mxu1 %v732_v9 }
  0x13   :  { %252 = vmatpush1.bf16.msra.mxu0 %v734_v10  ;;  %715 = vmatpush1.bf16.msra.mxu1 %v734_v10 }
  0x14   :  { %253 = vmatprep.subr.bf16.mxu0 %v735_v11  ;;  %708 = vmatprep.subr.bf16.mxu1 %v735_v11 }
  0x17   :  { %254 = vmatpush1.bf16.msra.mxu0 %v737_v12  ;;  %716 = vmatpush1.bf16.msra.mxu1 %v737_v12 }
  0x18   :  { %255 = vmatprep.subr.bf16.mxu0 %v738_v13  ;;  %709 = vmatprep.subr.bf16.mxu1 %v738_v13 }
  0x1b   :  { %256 = vmatpush1.bf16.msra.mxu0 %v740_v14  ;;  %717 = vmatpush1.bf16.msra.mxu1 %v740_v14 }
  0x1c   :  { %257 = vmatprep.subr.bf16.mxu0 %v741_v15  ;;  %710 = vmatprep.subr.bf16.mxu1 %v741_v15 }
  0x1f   :  { %258 = vmatpush1.bf16.msra.mxu0 %v743_v16  ;;  %718 = vmatpush1.bf16.msra.mxu1 %v743_v16 }
  0x22   :  { %276 = vmatmul.mubr.bf16.vlgmr.msra.gmra.mxu0 %v744_v17  ;;  %316 = vmatmul.mubr.bf16.vlgmr.msra.gmra.mxu1 %v745_v18 }
  0x23   :  { %285 = vmatprep.mubr.bf16.mxu0 %v752_v1  ;;  %325 = vmatprep.mubr.bf16.mxu1 %v752_v1 }
  0x2a   :  { %286 = vmatmul.mubr.bf16.gmra.mxu0 %v746_v19  ;;  %326 = vmatmul.mubr.bf16.gmra.mxu1 %v747_v20 }
  0x2b   :  { %295 = vmatprep.mubr.bf16.mxu0 %v752_v1  ;;  %335 = vmatprep.mubr.bf16.mxu1 %v752_v1 }
  0x32   :  { %296 = vmatmul.mubr.bf16.gmra.mxu0 %v748_v21  ;;  %336 = vmatmul.mubr.bf16.gmra.mxu1 %v749_v22 }
  0x33   :  { %305 = vmatprep.mubr.bf16.mxu0 %v752_v1  ;;  %345 = vmatprep.mubr.bf16.mxu1 %v752_v1 }
  0x3a   :  { %306 = vmatmul.mubr.bf16.gmra.mxu0 %v750_v23  ;;  %346 = vmatmul.mubr.bf16.gmra.mxu1 %v751_v24 }
  0xe2   :  { %v277_v32 = vpop.f32.mrf.mxu0  ;;  %v317_v33 = vpop.f32.mrf.mxu1 }
  0xe3   :  { %v467_v34 = vadd.f32 %v856_v30, %v277_v32  ;;  %v483_v35 = vadd.f32 %v856_v30, %v317_v33 }
  0xe4   :  { %v279_v36 = vpop.f32.mrf.mxu0  ;;  %v319_v37 = vpop.f32.mrf.mxu1 }
  0xe5   :  { %v468_v38 = vadd.f32 %v858_v31, %v279_v36  ;;  %v484_v39 = vadd.f32 %v858_v31, %v319_v37  ;;  %v499_v42 = vmax.f32 %v467_v34, 0.0  ;;  %v515_v43 = vmax.f32 %v483_v35, 0.0 }
  0xe6   :  { %v281_v40 = vpop.f32.mrf.mxu0  ;;  %v321_v41 = vpop.f32.mrf.mxu1 }
  0xe7   :  { %v500_v44 = vmax.f32 %v468_v38, 0.0  ;;  %v516_v45 = vmax.f32 %v484_v39, 0.0  ;;  %v469_v46 = vadd.f32 %v856_v30, %v281_v40  ;;  %v485_v47 = vadd.f32 %v856_v30, %v321_v41 }
  0xe8   :  { %v283_v48 = vpop.f32.mrf.mxu0  ;;  %v323_v49 = vpop.f32.mrf.mxu1 }
  0xe9   :  { %v687_v50 = vpack.c.bf16 %v500_v44, %v499_v42  ;;  %v695_v51 = vpack.c.bf16 %v516_v45, %v515_v43  ;;  %v470_v52 = vadd.f32 %v858_v31, %v283_v48  ;;  %v486_v53 = vadd.f32 %v858_v31, %v323_v49 }
  0xea   :  { %v287_v54 = vpop.f32.mrf.mxu0  ;;  %v327_v55 = vpop.f32.mrf.mxu1  ;;  %v501_v58 = vmax.f32 %v469_v46, 0.0  ;;  %v517_v59 = vmax.f32 %v485_v47, 0.0 }
  0xeb   :  { %627 = vst [vmem:[%s943_s3] sm:$0xff] %v687_v50  ;;  %635 = vst [vmem:[%s943_s3 + $0x40] sm:$0xff] %v695_v51  ;;  %v471_v56 = vadd.f32 %v856_v30, %v287_v54  ;;  %v487_v57 = vadd.f32 %v856_v30, %v327_v55  ;;  %v502_v60 = vmax.f32 %v470_v52, 0.0  ;;  %v518_v61 = vmax.f32 %v486_v53, 0.0 }
  0xec   :  { %v289_v62 = vpop.f32.mrf.mxu0  ;;  %v329_v63 = vpop.f32.mrf.mxu1 }
  0xed   :  { %v472_v0 = vadd.f32 %v858_v31, %v289_v62  ;;  %v488_v1 = vadd.f32 %v858_v31, %v329_v63  ;;  %v688_v2 = vpack.c.bf16 %v502_v60, %v501_v58  ;;  %v696_v3 = vpack.c.bf16 %v518_v61, %v517_v59 }
  0xee   :  { %v291_v4 = vpop.f32.mrf.mxu0  ;;  %v331_v5 = vpop.f32.mrf.mxu1  ;;  %v503_v6 = vmax.f32 %v471_v56, 0.0  ;;  %v519_v7 = vmax.f32 %v487_v57, 0.0 }
  0xef   :  { %v504_v8 = vmax.f32 %v472_v0, 0.0  ;;  %v520_v9 = vmax.f32 %v488_v1, 0.0  ;;  %628 = vst [vmem:[%s943_s3 + $0x8] sm:$0xff] %v688_v2  ;;  %636 = vst [vmem:[%s943_s3 + $0x48] sm:$0xff] %v696_v3  ;;  %v473_v10 = vadd.f32 %v856_v30, %v291_v4  ;;  %v489_v11 = vadd.f32 %v856_v30, %v331_v5 }
  0xf0   :  { %v293_v12 = vpop.f32.mrf.mxu0  ;;  %v333_v13 = vpop.f32.mrf.mxu1 }
  0xf1   :  { %v689_v14 = vpack.c.bf16 %v504_v8, %v503_v6  ;;  %v697_v15 = vpack.c.bf16 %v520_v9, %v519_v7  ;;  %v474_v16 = vadd.f32 %v858_v31, %v293_v12  ;;  %v490_v17 = vadd.f32 %v858_v31, %v333_v13 }
  0xf2   :  { %v297_v18 = vpop.f32.mrf.mxu0  ;;  %v337_v19 = vpop.f32.mrf.mxu1  ;;  %v505_v22 = vmax.f32 %v473_v10, 0.0  ;;  %v521_v23 = vmax.f32 %v489_v11, 0.0 }
  0xf3   :  { %629 = vst [vmem:[%s943_s3 + $0x10] sm:$0xff] %v689_v14  ;;  %637 = vst [vmem:[%s943_s3 + $0x50] sm:$0xff] %v697_v15  ;;  %v475_v20 = vadd.f32 %v856_v30, %v297_v18  ;;  %v491_v21 = vadd.f32 %v856_v30, %v337_v19  ;;  %v506_v24 = vmax.f32 %v474_v16, 0.0  ;;  %v522_v25 = vmax.f32 %v490_v17, 0.0 }
  0xf4   :  { %v299_v26 = vpop.f32.mrf.mxu0  ;;  %v339_v27 = vpop.f32.mrf.mxu1 }
  0xf5   :  { %v476_v28 = vadd.f32 %v858_v31, %v299_v26  ;;  %v492_v29 = vadd.f32 %v858_v31, %v339_v27  ;;  %v690_v32 = vpack.c.bf16 %v506_v24, %v505_v22  ;;  %v698_v33 = vpack.c.bf16 %v522_v25, %v521_v23 }
  0xf6   :  { %v301_v34 = vpop.f32.mrf.mxu0  ;;  %v341_v35 = vpop.f32.mrf.mxu1  ;;  %v507_v36 = vmax.f32 %v475_v20, 0.0  ;;  %v523_v37 = vmax.f32 %v491_v21, 0.0 }
  0xf7   :  { %v508_v38 = vmax.f32 %v476_v28, 0.0  ;;  %v524_v39 = vmax.f32 %v492_v29, 0.0  ;;  %630 = vst [vmem:[%s943_s3 + $0x18] sm:$0xff] %v690_v32  ;;  %638 = vst [vmem:[%s943_s3 + $0x58] sm:$0xff] %v698_v33  ;;  %v477_v40 = vadd.f32 %v856_v30, %v301_v34  ;;  %v493_v41 = vadd.f32 %v856_v30, %v341_v35 }
  0xf8   :  { %v303_v42 = vpop.f32.mrf.mxu0  ;;  %v343_v43 = vpop.f32.mrf.mxu1 }
  0xf9   :  { %v691_v44 = vpack.c.bf16 %v508_v38, %v507_v36  ;;  %v699_v45 = vpack.c.bf16 %v524_v39, %v523_v37  ;;  %v478_v46 = vadd.f32 %v858_v31, %v303_v42  ;;  %v494_v47 = vadd.f32 %v858_v31, %v343_v43 }
  0xfa   :  { %v307_v48 = vpop.f32.mrf.mxu0  ;;  %v347_v49 = vpop.f32.mrf.mxu1  ;;  %v509_v52 = vmax.f32 %v477_v40, 0.0  ;;  %v525_v53 = vmax.f32 %v493_v41, 0.0 }
  0xfb   :  { %631 = vst [vmem:[%s943_s3 + $0x20] sm:$0xff] %v691_v44  ;;  %639 = vst [vmem:[%s943_s3 + $0x60] sm:$0xff] %v699_v45  ;;  %v479_v50 = vadd.f32 %v856_v30, %v307_v48  ;;  %v495_v51 = vadd.f32 %v856_v30, %v347_v49  ;;  %v510_v54 = vmax.f32 %v478_v46, 0.0  ;;  %v526_v55 = vmax.f32 %v494_v47, 0.0 }
  0xfc   :  { %v309_v56 = vpop.f32.mrf.mxu0  ;;  %v349_v57 = vpop.f32.mrf.mxu1 }
  0xfd   :  { %v480_v58 = vadd.f32 %v858_v31, %v309_v56  ;;  %v496_v59 = vadd.f32 %v858_v31, %v349_v57  ;;  %v692_v60 = vpack.c.bf16 %v510_v54, %v509_v52  ;;  %v700_v61 = vpack.c.bf16 %v526_v55, %v525_v53 }
  0xfe   :  { %v311_v62 = vpop.f32.mrf.mxu0  ;;  %v351_v63 = vpop.f32.mrf.mxu1  ;;  %v511_v0 = vmax.f32 %v479_v50, 0.0  ;;  %v527_v1 = vmax.f32 %v495_v51, 0.0 }
  0xff   :  { %v512_v2 = vmax.f32 %v480_v58, 0.0  ;;  %v528_v3 = vmax.f32 %v496_v59, 0.0  ;;  %632 = vst [vmem:[%s943_s3 + $0x28] sm:$0xff] %v692_v60  ;;  %640 = vst [vmem:[%s943_s3 + $0x68] sm:$0xff] %v700_v61  ;;  %v481_v4 = vadd.f32 %v856_v30, %v311_v62  ;;  %v497_v5 = vadd.f32 %v856_v30, %v351_v63 }
 0x100   :  { %v313_v6 = vpop.f32.mrf.mxu0  ;;  %v353_v7 = vpop.f32.mrf.mxu1 }
 0x101   :  { %v693_v8 = vpack.c.bf16 %v512_v2, %v511_v0  ;;  %v701_v9 = vpack.c.bf16 %v528_v3, %v527_v1  ;;  %v482_v10 = vadd.f32 %v858_v31, %v313_v6  ;;  %v498_v11 = vadd.f32 %v858_v31, %v353_v7 }
 0x102   :  { %v513_v12 = vmax.f32 %v481_v4, 0.0  ;;  %v529_v13 = vmax.f32 %v497_v5, 0.0 }
 0x103   :  { %633 = vst [vmem:[%s943_s3 + $0x30] sm:$0xff] %v693_v8  ;;  %641 = vst [vmem:[%s943_s3 + $0x70] sm:$0xff] %v701_v9  ;;  %v514_v14 = vmax.f32 %v482_v10, 0.0  ;;  %v530_v30 = vmax.f32 %v498_v11, 0.0 }
 0x105   :  { %v694_v15 = vpack.c.bf16 %v514_v14, %v513_v12  ;;  %v702_v16 = vpack.c.bf16 %v530_v30, %v529_v13 }
 0x107   :  { %634 = vst [vmem:[%s943_s3 + $0x38] sm:$0xff] %v694_v15  ;;  %642 = vst [vmem:[%s943_s3 + $0x78] sm:$0xff] %v702_v16 }

// kernel: _forward_shared.7
= control target key start
LH: loop header
LB: loop body
LE: loop exit
PB: predicated region body
PF: predicated region fallthrough
CT: control target
= control target key end

     0   :  { %v608_v1 = vmov 0   ;;  %v457_v25 = vlaneseq  ;;  %s844_s1 = inlined_call_operand.vmem [shape: bf16[128,256], index: 1, kind: input, shape index: {}]   ;;  %s845_s0 = inlined_call_operand.vmem [shape: bf16[128,128], index: 0, kind: input, shape index: {}]   ;;  %s846_s2 = inlined_call_operand.vmem [shape: f32[1,256], index: 2, kind: input, shape index: {}]   ;;  %s847_s3 = inlined_call_operand.vmem [shape: f32[128,256], index: 3, kind: output, shape index: {}]  }
   0x1   :  { %v576_v0 = vld [vmem:[%s844_s1 + $0x74] ss:$8 sps:$4 sm:$0xff]   ;;  %275 = vmatprep.mubr.bf16.mxu0 %v608_v1  ;;  %315 = vmatprep.mubr.bf16.mxu1 %v608_v1  ;;  %v578_v2 = vld [vmem:[%s844_s1 + $0x70] ss:$8 sps:$4 sm:$0xff]   ;;  %v579_v3 = vld [vmem:[%s844_s1 + $0x64] ss:$8 sps:$4 sm:$0xff]  }
   0x2   :  { %243 = vmatprep.subr.bf16.mxu0 %v576_v0  ;;  %559 = vmatprep.subr.bf16.mxu1 %v576_v0  ;;  %v581_v4 = vld [vmem:[%s844_s1 + $0x60] ss:$8 sps:$4 sm:$0xff]   ;;  %v582_v5 = vld [vmem:[%s844_s1 + $0x54] ss:$8 sps:$4 sm:$0xff]   ;;  %v584_v6 = vld [vmem:[%s844_s1 + $0x50] ss:$8 sps:$4 sm:$0xff]  }
   0x3   :  { %244 = vmatpush1.bf16.msra.mxu0 %v578_v2  ;;  %567 = vmatpush1.bf16.msra.mxu1 %v578_v2  ;;  %v585_v7 = vld [vmem:[%s844_s1 + $0x44] ss:$8 sps:$4 sm:$0xff]   ;;  %v587_v8 = vld [vmem:[%s844_s1 + $0x40] ss:$8 sps:$4 sm:$0xff]   ;;  %v588_v9 = vld [vmem:[%s844_s1 + $0x34] ss:$8 sps:$4 sm:$0xff]  }
   0x4   :  { %245 = vmatprep.subr.bf16.mxu0 %v579_v3  ;;  %560 = vmatprep.subr.bf16.mxu1 %v579_v3  ;;  %v590_v10 = vld [vmem:[%s844_s1 + $0x30] ss:$8 sps:$4 sm:$0xff]   ;;  %v591_v11 = vld [vmem:[%s844_s1 + $0x24] ss:$8 sps:$4 sm:$0xff]   ;;  %v593_v12 = vld [vmem:[%s844_s1 + $0x20] ss:$8 sps:$4 sm:$0xff]  }
   0x5   :  { %v594_v13 = vld [vmem:[%s844_s1 + $0x14] ss:$8 sps:$4 sm:$0xff]   ;;  %v596_v14 = vld [vmem:[%s844_s1 + $0x10] ss:$8 sps:$4 sm:$0xff]   ;;  %v597_v15 = vld [vmem:[%s844_s1 + $0x4] ss:$8 sps:$4 sm:$0xff]  }
   0x6   :  { %v599_v16 = vld [vmem:[%s844_s1] ss:$8 sps:$4 sm:$0xff]   ;;  %v604_v21 = vld [vmem:[%s845_s0 + $0x10] sm:$0xff]   ;;  %v606_v23 = vld [vmem:[%s845_s0 + $0x18] sm:$0xff]   ;;  %v458_v26 = vshrl.u32 %v457_v25, 7 }
   0x7   :  { %246 = vmatpush1.bf16.msra.mxu0 %v581_v4  ;;  %568 = vmatpush1.bf16.msra.mxu1 %v581_v4  ;;  %v600_v17 = vld [vmem:[%s845_s0] sm:$0xff]   ;;  %v602_v19 = vld [vmem:[%s845_s0 + $0x8] sm:$0xff]   ;;  %v605_v22 = vld [vmem:[%s845_s0 + $0x30] sm:$0xff]  }
   0x8   :  { %247 = vmatprep.subr.bf16.mxu0 %v582_v5  ;;  %561 = vmatprep.subr.bf16.mxu1 %v582_v5  ;;  %v601_v18 = vld [vmem:[%s845_s0 + $0x20] sm:$0xff]   ;;  %v603_v20 = vld [vmem:[%s845_s0 + $0x28] sm:$0xff]   ;;  %v607_v24 = vld [vmem:[%s845_s0 + $0x38] sm:$0xff]   ;;  %v459_v27 = vsub.s32 0, %v458_v26  ;;  %v463_v29 = vsub.s32 1, %v458_v26 }
   0x9   :  { %v455_v28 = vld [vmem:[%s846_s2] sm:$0x3] }
   0xa   :  { %v712_v30 = vrot.slane %v455_v28, %v459_v27  ;;  %v714_v31 = vrot.slane %v455_v28, %v463_v29 }
   0xb   :  { %248 = vmatpush1.bf16.msra.mxu0 %v584_v6  ;;  %569 = vmatpush1.bf16.msra.mxu1 %v584_v6 }
   0xc   :  { %249 = vmatprep.subr.bf16.mxu0 %v585_v7  ;;  %562 = vmatprep.subr.bf16.mxu1 %v585_v7 }
   0xf   :  { %250 = vmatpush1.bf16.msra.mxu0 %v587_v8  ;;  %570 = vmatpush1.bf16.msra.mxu1 %v587_v8 }
  0x10   :  { %251 = vmatprep.subr.bf16.mxu0 %v588_v9  ;;  %563 = vmatprep.subr.bf16.mxu1 %v588_v9 }
  0x13   :  { %252 = vmatpush1.bf16.msra.mxu0 %v590_v10  ;;  %571 = vmatpush1.bf16.msra.mxu1 %v590_v10 }
  0x14   :  { %253 = vmatprep.subr.bf16.mxu0 %v591_v11  ;;  %564 = vmatprep.subr.bf16.mxu1 %v591_v11 }
  0x17   :  { %254 = vmatpush1.bf16.msra.mxu0 %v593_v12  ;;  %572 = vmatpush1.bf16.msra.mxu1 %v593_v12 }
  0x18   :  { %255 = vmatprep.subr.bf16.mxu0 %v594_v13  ;;  %565 = vmatprep.subr.bf16.mxu1 %v594_v13 }
  0x1b   :  { %256 = vmatpush1.bf16.msra.mxu0 %v596_v14  ;;  %573 = vmatpush1.bf16.msra.mxu1 %v596_v14 }
  0x1c   :  { %257 = vmatprep.subr.bf16.mxu0 %v597_v15  ;;  %566 = vmatprep.subr.bf16.mxu1 %v597_v15 }
  0x1f   :  { %258 = vmatpush1.bf16.msra.mxu0 %v599_v16  ;;  %574 = vmatpush1.bf16.msra.mxu1 %v599_v16 }
  0x22   :  { %276 = vmatmul.mubr.bf16.vlgmr.msra.gmra.mxu0 %v600_v17  ;;  %316 = vmatmul.mubr.bf16.vlgmr.msra.gmra.mxu1 %v601_v18 }
  0x23   :  { %285 = vmatprep.mubr.bf16.mxu0 %v608_v1  ;;  %325 = vmatprep.mubr.bf16.mxu1 %v608_v1 }
  0x2a   :  { %286 = vmatmul.mubr.bf16.gmra.mxu0 %v602_v19  ;;  %326 = vmatmul.mubr.bf16.gmra.mxu1 %v603_v20 }
  0x2b   :  { %295 = vmatprep.mubr.bf16.mxu0 %v608_v1  ;;  %335 = vmatprep.mubr.bf16.mxu1 %v608_v1 }
  0x32   :  { %296 = vmatmul.mubr.bf16.gmra.mxu0 %v604_v21  ;;  %336 = vmatmul.mubr.bf16.gmra.mxu1 %v605_v22 }
  0x33   :  { %305 = vmatprep.mubr.bf16.mxu0 %v608_v1  ;;  %345 = vmatprep.mubr.bf16.mxu1 %v608_v1 }
  0x3a   :  { %306 = vmatmul.mubr.bf16.gmra.mxu0 %v606_v23  ;;  %346 = vmatmul.mubr.bf16.gmra.mxu1 %v607_v24 }
  0xe2   :  { %v277_v32 = vpop.f32.mrf.mxu0  ;;  %v317_v33 = vpop.f32.mrf.mxu1 }
  0xe3   :  { %v467_v34 = vadd.f32 %v712_v30, %v277_v32  ;;  %v483_v35 = vadd.f32 %v712_v30, %v317_v33 }
  0xe4   :  { %v279_v36 = vpop.f32.mrf.mxu0  ;;  %v319_v37 = vpop.f32.mrf.mxu1 }
  0xe5   :  { %499 = vst [vmem:[%s847_s3] sm:$0xff] %v467_v34  ;;  %515 = vst [vmem:[%s847_s3 + $0x80] sm:$0xff] %v483_v35  ;;  %v468_v38 = vadd.f32 %v714_v31, %v279_v36  ;;  %v484_v39 = vadd.f32 %v714_v31, %v319_v37 }
  0xe6   :  { %v281_v40 = vpop.f32.mrf.mxu0  ;;  %v321_v41 = vpop.f32.mrf.mxu1 }
  0xe7   :  { %500 = vst [vmem:[%s847_s3 + $0x8] sm:$0xff] %v468_v38  ;;  %516 = vst [vmem:[%s847_s3 + $0x88] sm:$0xff] %v484_v39  ;;  %v469_v42 = vadd.f32 %v712_v30, %v281_v40  ;;  %v485_v43 = vadd.f32 %v712_v30, %v321_v41 }
  0xe8   :  { %v283_v44 = vpop.f32.mrf.mxu0  ;;  %v323_v45 = vpop.f32.mrf.mxu1 }
  0xe9   :  { %501 = vst [vmem:[%s847_s3 + $0x10] sm:$0xff] %v469_v42  ;;  %517 = vst [vmem:[%s847_s3 + $0x90] sm:$0xff] %v485_v43  ;;  %v470_v46 = vadd.f32 %v714_v31, %v283_v44  ;;  %v486_v47 = vadd.f32 %v714_v31, %v323_v45 }
  0xea   :  { %v287_v48 = vpop.f32.mrf.mxu0  ;;  %v327_v49 = vpop.f32.mrf.mxu1 }
  0xeb   :  { %502 = vst [vmem:[%s847_s3 + $0x18] sm:$0xff] %v470_v46  ;;  %518 = vst [vmem:[%s847_s3 + $0x98] sm:$0xff] %v486_v47  ;;  %v471_v50 = vadd.f32 %v712_v30, %v287_v48  ;;  %v487_v51 = vadd.f32 %v712_v30, %v327_v49 }
  0xec   :  { %v289_v52 = vpop.f32.mrf.mxu0  ;;  %v329_v53 = vpop.f32.mrf.mxu1 }
  0xed   :  { %503 = vst [vmem:[%s847_s3 + $0x20] sm:$0xff] %v471_v50  ;;  %519 = vst [vmem:[%s847_s3 + $0xa0] sm:$0xff] %v487_v51  ;;  %v472_v54 = vadd.f32 %v714_v31, %v289_v52  ;;  %v488_v55 = vadd.f32 %v714_v31, %v329_v53 }
  0xee   :  { %v291_v56 = vpop.f32.mrf.mxu0  ;;  %v331_v57 = vpop.f32.mrf.mxu1 }
  0xef   :  { %504 = vst [vmem:[%s847_s3 + $0x28] sm:$0xff] %v472_v54  ;;  %520 = vst [vmem:[%s847_s3 + $0xa8] sm:$0xff] %v488_v55  ;;  %v473_v58 = vadd.f32 %v712_v30, %v291_v56  ;;  %v489_v59 = vadd.f32 %v712_v30, %v331_v57 }
  0xf0   :  { %v293_v60 = vpop.f32.mrf.mxu0  ;;  %v333_v61 = vpop.f32.mrf.mxu1 }
  0xf1   :  { %505 = vst [vmem:[%s847_s3 + $0x30] sm:$0xff] %v473_v58  ;;  %521 = vst [vmem:[%s847_s3 + $0xb0] sm:$0xff] %v489_v59  ;;  %v474_v62 = vadd.f32 %v714_v31, %v293_v60  ;;  %v490_v63 = vadd.f32 %v714_v31, %v333_v61 }
  0xf2   :  { %v297_v0 = vpop.f32.mrf.mxu0  ;;  %v337_v1 = vpop.f32.mrf.mxu1 }
  0xf3   :  { %506 = vst [vmem:[%s847_s3 + $0x38] sm:$0xff] %v474_v62  ;;  %522 = vst [vmem:[%s847_s3 + $0xb8] sm:$0xff] %v490_v63  ;;  %v475_v2 = vadd.f32 %v712_v30, %v297_v0  ;;  %v491_v3 = vadd.f32 %v712_v30, %v337_v1 }
  0xf4   :  { %v299_v4 = vpop.f32.mrf.mxu0  ;;  %v339_v5 = vpop.f32.mrf.mxu1 }
  0xf5   :  { %507 = vst [vmem:[%s847_s3 + $0x40] sm:$0xff] %v475_v2  ;;  %523 = vst [vmem:[%s847_s3 + $0xc0] sm:$0xff] %v491_v3  ;;  %v476_v6 = vadd.f32 %v714_v31, %v299_v4  ;;  %v492_v7 = vadd.f32 %v714_v31, %v339_v5 }
  0xf6   :  { %v301_v8 = vpop.f32.mrf.mxu0  ;;  %v341_v9 = vpop.f32.mrf.mxu1 }
  0xf7   :  { %508 = vst [vmem:[%s847_s3 + $0x48] sm:$0xff] %v476_v6  ;;  %524 = vst [vmem:[%s847_s3 + $0xc8] sm:$0xff] %v492_v7  ;;  %v477_v10 = vadd.f32 %v712_v30, %v301_v8  ;;  %v493_v11 = vadd.f32 %v712_v30, %v341_v9 }
  0xf8   :  { %v303_v12 = vpop.f32.mrf.mxu0  ;;  %v343_v13 = vpop.f32.mrf.mxu1 }
  0xf9   :  { %509 = vst [vmem:[%s847_s3 + $0x50] sm:$0xff] %v477_v10  ;;  %525 = vst [vmem:[%s847_s3 + $0xd0] sm:$0xff] %v493_v11  ;;  %v478_v14 = vadd.f32 %v714_v31, %v303_v12  ;;  %v494_v15 = vadd.f32 %v714_v31, %v343_v13 }
  0xfa   :  { %v307_v16 = vpop.f32.mrf.mxu0  ;;  %v347_v17 = vpop.f32.mrf.mxu1 }
  0xfb   :  { %510 = vst [vmem:[%s847_s3 + $0x58] sm:$0xff] %v478_v14  ;;  %526 = vst [vmem:[%s847_s3 + $0xd8] sm:$0xff] %v494_v15  ;;  %v479_v18 = vadd.f32 %v712_v30, %v307_v16  ;;  %v495_v19 = vadd.f32 %v712_v30, %v347_v17 }
  0xfc   :  { %v309_v20 = vpop.f32.mrf.mxu0  ;;  %v349_v21 = vpop.f32.mrf.mxu1 }
  0xfd   :  { %511 = vst [vmem:[%s847_s3 + $0x60] sm:$0xff] %v479_v18  ;;  %527 = vst [vmem:[%s847_s3 + $0xe0] sm:$0xff] %v495_v19  ;;  %v480_v22 = vadd.f32 %v714_v31, %v309_v20  ;;  %v496_v23 = vadd.f32 %v714_v31, %v349_v21 }
  0xfe   :  { %v311_v24 = vpop.f32.mrf.mxu0  ;;  %v351_v25 = vpop.f32.mrf.mxu1 }
  0xff   :  { %512 = vst [vmem:[%s847_s3 + $0x68] sm:$0xff] %v480_v22  ;;  %528 = vst [vmem:[%s847_s3 + $0xe8] sm:$0xff] %v496_v23  ;;  %v481_v26 = vadd.f32 %v712_v30, %v311_v24  ;;  %v497_v27 = vadd.f32 %v712_v30, %v351_v25 }
 0x100   :  { %v313_v28 = vpop.f32.mrf.mxu0  ;;  %v353_v29 = vpop.f32.mrf.mxu1 }
 0x101   :  { %513 = vst [vmem:[%s847_s3 + $0x70] sm:$0xff] %v481_v26  ;;  %529 = vst [vmem:[%s847_s3 + $0xf0] sm:$0xff] %v497_v27  ;;  %v482_v32 = vadd.f32 %v714_v31, %v313_v28  ;;  %v498_v33 = vadd.f32 %v714_v31, %v353_v29 }
 0x103   :  { %514 = vst [vmem:[%s847_s3 + $0x78] sm:$0xff] %v482_v32  ;;  %530 = vst [vmem:[%s847_s3 + $0xf8] sm:$0xff] %v498_v33 }

</bundles_post_ra>
